<compile_context>
chip_gen: v5e
topology: v5e:2x2
jax: 0.10.0
libtpu: 0.0.40
codegen_flags: <defaults>
</compile_context>

<pallas_src>
import functools

import jax
import jax.numpy as jnp
from jax import lax
from jax.experimental import pallas as pl
from jax.experimental.pallas import tpu as pltpu


def _routing_kernel(x_ref, w_ref, vals_ref, idx_ref, *, k: int,
                    n_experts: int, e_pad: int):
    x = x_ref[...]                      # (tile_bs, in_dim), native dtype
    w = w_ref[...]                      # (in_dim, 2*e_pad), VMEM-resident

    # Fused gate + noise projection: a single MXU pass, f32 accumulation.
    proj = jnp.dot(x, w, preferred_element_type=jnp.float32)  # (tile_bs, 2*e_pad)
    g = proj[:, :e_pad]
    n = proj[:, e_pad:]

    # Stable softplus with one exp + one log1p per element (matches
    # torch.nn.functional.softplus to < 2e-9 past its threshold of 20).
    sp = jnp.maximum(n, 0.0) + jnp.log1p(jnp.exp(-jnp.abs(n)))

    neg_inf = jnp.float32(-jnp.inf)
    logits = g + sp
    if n_experts != e_pad:
        # Mask padded expert columns so they never win softmax / top-k.
        col = lax.broadcasted_iota(jnp.int32, logits.shape, 1)
        logits = jnp.where(col < n_experts, logits, neg_inf)

    # Numerically-stable softmax over the (lane) expert axis.
    m = jnp.max(logits, axis=-1, keepdims=True)
    ex = jnp.exp(logits - m)
    probs = ex * pl.reciprocal(jnp.sum(ex, axis=-1, keepdims=True), approx=True)

    # Transpose once so tokens sit on lanes: the k max/argmax reductions then
    # run over sublanes and yield lane-dense (1, tile_bs) rows, concatenated
    # into a single full-width store per output (no narrow masked column vst).
    pt = probs.T                                              # (e_pad, tile_bs)
    row = lax.broadcasted_iota(jnp.int32, pt.shape, 0)
    vals_rows, idx_rows = [], []
    v = pt
    for _ in range(k):
        mx = jnp.max(v, axis=0, keepdims=True)                          # (1, tile_bs)
        ix = jnp.min(jnp.where(v == mx, row, e_pad), axis=0,
                     keepdims=True).astype(jnp.int32)                   # (1, tile_bs)
        vals_rows.append(mx)
        idx_rows.append(ix)
        v = jnp.where(row == ix, neg_inf, v)                 # drop selected expert

    vals_ref[...] = jnp.concatenate(vals_rows, axis=0).astype(vals_ref.dtype)
    idx_ref[...] = jnp.concatenate(idx_rows, axis=0)


def routing_forward(x, w_g, w_noise, k: int, tile_bs: int | None = None):
    """x: [bs, in_dim]; w_g, w_noise: [in_dim, n_experts] (pre-transposed).

    Returns (values, indices), each [bs, k], matching
    torch.topk(softmax(W_g(x) + softplus(W_noise(x))), k).
    """
    bs, in_dim = x.shape
    n_experts = w_g.shape[1]
    assert w_noise.shape == (in_dim, n_experts)
    assert k <= n_experts

    # Lane-pad the expert axis and fuse the two projections into one weight:
    # columns [:E] are the gate, columns [e_pad : e_pad+E] are the noise.
    e_pad = ((n_experts + 127) // 128) * 128
    w_fused = jnp.zeros((in_dim, 2 * e_pad), dtype=x.dtype)
    w_fused = w_fused.at[:, :n_experts].set(w_g.astype(x.dtype))
    w_fused = w_fused.at[:, e_pad:e_pad + n_experts].set(w_noise.astype(x.dtype))

    if tile_bs is None:
        # 512 rows keeps 2-deep buffering comfortably inside v7x's 64 MiB VMEM;
        # small batches collapse to a single lane-aligned tile (tile_bs lives
        # on the lane axis of the outputs, so keep it a multiple of 128).
        tile_bs = min(512, ((bs + 127) // 128) * 128)
    bs_pad = ((bs + tile_bs - 1) // tile_bs) * tile_bs
    x_p = x if bs_pad == bs else jnp.pad(x, ((0, bs_pad - bs), (0, 0)))
    grid = (bs_pad // tile_bs,)

    itemsize = jnp.dtype(x.dtype).itemsize
    cost = pl.CostEstimate(
        flops=2 * bs_pad * in_dim * 2 * e_pad,
        transcendentals=3 * bs_pad * e_pad,
        bytes_accessed=(bs_pad * in_dim * itemsize
                        + in_dim * 2 * e_pad * itemsize
                        + 2 * k * bs_pad * 4),
    )

    # Explicit scoped-VMEM budget (defaults differ across v5e/v6e/v7x).
    per_step = (tile_bs * in_dim * itemsize            # x tile
                + in_dim * 2 * e_pad * itemsize        # resident fused weights
                + 6 * tile_bs * 2 * e_pad * 4          # f32 intermediates
                + 2 * k * tile_bs * 4)                 # output tiles
    vmem_limit = int(min(48 * 1024 * 1024, max(16 * 1024 * 1024, 3 * per_step)))

    kernel = functools.partial(_routing_kernel, k=k, n_experts=n_experts,
                               e_pad=e_pad)
    vals_t, idx_t = pl.pallas_call(
        kernel,
        grid=grid,
        in_specs=[
            pl.BlockSpec((tile_bs, in_dim), lambda i: (i, 0)),
            pl.BlockSpec((in_dim, 2 * e_pad), lambda i: (0, 0)),  # stays resident
        ],
        out_specs=(
            pl.BlockSpec((k, tile_bs), lambda i: (0, i)),
            pl.BlockSpec((k, tile_bs), lambda i: (0, i)),
        ),
        out_shape=(
            jax.ShapeDtypeStruct((k, bs_pad), jnp.float32),  # top-k values
            jax.ShapeDtypeStruct((k, bs_pad), jnp.int32),    # top-k indices
        ),
        compiler_params=pltpu.CompilerParams(
            dimension_semantics=("parallel",),
            vmem_limit_bytes=vmem_limit,
        ),
        cost_estimate=cost,
    )(x_p, w_fused)

    # Back to (bs, k), dropping token padding.
    return vals_t[:, :bs].T, idx_t[:, :bs].T


def _reference(x, w_g, w_noise, k):
    n = x @ w_noise
    sp = jnp.maximum(n, 0.0) + jnp.log1p(jnp.exp(-jnp.abs(n)))
    probs = jax.nn.softmax(x @ w_g + sp, axis=-1)
    return lax.top_k(probs, k)


if __name__ == "__main__":
    bs, in_dim, n_experts, k = 8, 32, 16, 2

    key = jax.random.PRNGKey(0)
    kx, kg, kn = jax.random.split(key, 3)

    x = jax.random.normal(kx, (bs, in_dim), dtype=jnp.float32)

    # Deterministic init mimicking nn.Linear default: U(-1/sqrt(in), 1/sqrt(in)).
    bound = 1.0 / jnp.sqrt(jnp.float32(in_dim))
    # Stored as [in_dim, n_experts] == PyTorch weight.T
    w_g = jax.random.uniform(kg, (in_dim, n_experts), jnp.float32, -bound, bound)
    w_noise = jax.random.uniform(kn, (in_dim, n_experts), jnp.float32, -bound, bound)

    vals, idx = routing_forward(x, w_g, w_noise, k)
    vals, idx = jax.block_until_ready((vals, idx))

    ref_vals, ref_idx = _reference(x, w_g, w_noise, k)
    assert vals.shape == (bs, k) and idx.shape == (bs, k)
    # approx=True reciprocal in the kernel softmax -> slightly looser value tol;
    # per-row uniform scaling does not change top-k ordering.
    assert jnp.allclose(vals, ref_vals, atol=1e-3, rtol=1e-2), "values mismatch"
    assert jnp.array_equal(idx, ref_idx), "indices mismatch"

    print("KERNEL_OK")
</pallas_src>

<mosaic_0001>
module attributes {stable_mosaic.version = 11 : i64} {
  func.func @_routing_kernel(%arg0: i32, %arg1: memref<128x32xf32, #tpu.memory_space<vmem>>, %arg2: memref<32x256xf32, #tpu.memory_space<vmem>>, %arg3: memref<2x128xf32, #tpu.memory_space<vmem>>, %arg4: memref<2x128xi32, #tpu.memory_space<vmem>>) attributes {dimension_semantics = [#tpu.dimension_semantics<parallel>], iteration_bounds = array<i64: 1>, scalar_prefetch = 0 : i64, scratch_operands = 0 : i64, tpu.core_type = #tpu.core_type<tc>, window_params = [{transform_indices = @transform_0, window_bounds = array<i64: 128, 32>}, {pipeline_mode = #tpu.pipeline_mode<synchronous>, transform_indices = @transform_1, window_bounds = array<i64: 32, 256>}, {transform_indices = @transform_2, window_bounds = array<i64: 2, 128>}, {transform_indices = @transform_3, window_bounds = array<i64: 2, 128>}]} {
    %c0 = arith.constant 0 : index
    %c0_0 = arith.constant 0 : index
    %0 = vector.load %arg1[%c0, %c0_0] : memref<128x32xf32, #tpu.memory_space<vmem>>, vector<128x32xf32>
    %c0_1 = arith.constant 0 : index
    %c0_2 = arith.constant 0 : index
    %1 = vector.load %arg2[%c0_1, %c0_2] : memref<32x256xf32, #tpu.memory_space<vmem>>, vector<32x256xf32>
    %cst = arith.constant dense<0.000000e+00> : vector<128x256xf32>
    %2 = tpu.matmul %0, %1, %cst {dimension_numbers = #tpu.dot_dimension_numbers<[1], [0], [0], [1], [0, 0, 1, 1], [], []>} : vector<128x32xf32>, vector<32x256xf32>, vector<128x256xf32> -> vector<128x256xf32>
    %3 = vector.extract_strided_slice %2 {offsets = [0, 0], sizes = [128, 128], strides = [1, 1]} : vector<128x256xf32> to vector<128x128xf32>
    %4 = vector.extract_strided_slice %2 {offsets = [0, 128], sizes = [128, 128], strides = [1, 1]} : vector<128x256xf32> to vector<128x128xf32>
    %cst_3 = arith.constant 0.000000e+00 : f32
    %5 = vector.broadcast %cst_3 : f32 to vector<128x128xf32>
    %6 = arith.maximumf %4, %5 : vector<128x128xf32>
    %7 = math.absf %4 : vector<128x128xf32>
    %cst_4 = arith.constant 0.000000e+00 : f32
    %8 = vector.broadcast %cst_4 : f32 to vector<128x128xf32>
    %9 = arith.subf %8, %7 : vector<128x128xf32>
    %10 = math.exp %9 : vector<128x128xf32>
    %11 = math.log1p %10 : vector<128x128xf32>
    %12 = arith.addf %6, %11 : vector<128x128xf32>
    %13 = arith.addf %3, %12 : vector<128x128xf32>
    %14 = tpu.iota {dimensions = array<i32: 1>} : vector<128x128xi32>
    %c16_i32 = arith.constant 16 : i32
    %15 = vector.broadcast %c16_i32 : i32 to vector<128x128xi32>
    %16 = arith.cmpi slt, %14, %15 : vector<128x128xi32>
    %cst_5 = arith.constant 0xFF800000 : f32
    %17 = vector.broadcast %cst_5 : f32 to vector<128x128xf32>
    %18 = arith.select %16, %13, %17 : vector<128x128xi1>, vector<128x128xf32>
    %cst_6 = arith.constant dense<0xFF800000> : vector<128xf32>
    %19 = vector.multi_reduction <maximumf>, %18, %cst_6 [1] : vector<128x128xf32> to vector<128xf32>
    %20 = vector.shape_cast %19 : vector<128xf32> to vector<128x1xf32>
    %21 = vector.broadcast %20 : vector<128x1xf32> to vector<128x128xf32>
    %22 = arith.subf %18, %21 : vector<128x128xf32>
    %23 = math.exp %22 : vector<128x128xf32>
    %cst_7 = arith.constant dense<0.000000e+00> : vector<128xf32>
    %24 = vector.multi_reduction <add>, %23, %cst_7 [1] : vector<128x128xf32> to vector<128xf32>
    %25 = vector.shape_cast %24 : vector<128xf32> to vector<128x1xf32>
    %26 = tpu.reciprocal %25 {approx = true} : vector<128x1xf32> -> vector<128x1xf32>
    %27 = vector.broadcast %26 : vector<128x1xf32> to vector<128x128xf32>
    %28 = arith.mulf %23, %27 : vector<128x128xf32>
    %29 = tpu.transpose %28, [1, 0] : vector<128x128xf32> -> vector<128x128xf32>
    %30 = tpu.iota {dimensions = array<i32: 0>} : vector<128x128xi32>
    %cst_8 = arith.constant dense<0xFF800000> : vector<128xf32>
    %31 = vector.multi_reduction <maximumf>, %29, %cst_8 [0] : vector<128x128xf32> to vector<128xf32>
    %32 = vector.shape_cast %31 : vector<128xf32> to vector<1x128xf32>
    %33 = vector.broadcast %32 : vector<1x128xf32> to vector<128x128xf32>
    %34 = arith.cmpf oeq, %29, %33 : vector<128x128xf32>
    %c128_i32 = arith.constant 128 : i32
    %35 = vector.broadcast %c128_i32 : i32 to vector<128x128xi32>
    %36 = arith.select %34, %30, %35 : vector<128x128xi1>, vector<128x128xi32>
    %cst_9 = arith.constant dense<2147483647> : vector<128xi32>
    %37 = vector.multi_reduction <minsi>, %36, %cst_9 [0] : vector<128x128xi32> to vector<128xi32>
    %38 = vector.shape_cast %37 : vector<128xi32> to vector<1x128xi32>
    %39 = vector.broadcast %38 : vector<1x128xi32> to vector<128x128xi32>
    %40 = arith.cmpi eq, %30, %39 : vector<128x128xi32>
    %cst_10 = arith.constant 0xFF800000 : f32
    %41 = vector.broadcast %cst_10 : f32 to vector<128x128xf32>
    %42 = arith.select %40, %41, %29 : vector<128x128xi1>, vector<128x128xf32>
    %cst_11 = arith.constant dense<0xFF800000> : vector<128xf32>
    %43 = vector.multi_reduction <maximumf>, %42, %cst_11 [0] : vector<128x128xf32> to vector<128xf32>
    %44 = vector.shape_cast %43 : vector<128xf32> to vector<1x128xf32>
    %45 = vector.broadcast %44 : vector<1x128xf32> to vector<128x128xf32>
    %46 = arith.cmpf oeq, %42, %45 : vector<128x128xf32>
    %c128_i32_12 = arith.constant 128 : i32
    %47 = vector.broadcast %c128_i32_12 : i32 to vector<128x128xi32>
    %48 = arith.select %46, %30, %47 : vector<128x128xi1>, vector<128x128xi32>
    %cst_13 = arith.constant dense<2147483647> : vector<128xi32>
    %49 = vector.multi_reduction <minsi>, %48, %cst_13 [0] : vector<128x128xi32> to vector<128xi32>
    %50 = vector.shape_cast %49 : vector<128xi32> to vector<1x128xi32>
    %51 = tpu.concatenate %32, %44 in 0 : vector<1x128xf32>, vector<1x128xf32> -> vector<2x128xf32>
    %c0_14 = arith.constant 0 : index
    %c0_15 = arith.constant 0 : index
    %52 = vector.load %arg3[%c0_14, %c0_15] : memref<2x128xf32, #tpu.memory_space<vmem>>, vector<2x128xf32>
    tpu.vector_store %arg3[%c0_14, %c0_15], %51 {strides = array<i32>} : memref<2x128xf32, #tpu.memory_space<vmem>>, vector<2x128xf32>,
    %53 = tpu.concatenate %38, %50 in 0 : vector<1x128xi32>, vector<1x128xi32> -> vector<2x128xi32>
    %c0_16 = arith.constant 0 : index
    %c0_17 = arith.constant 0 : index
    %54 = vector.load %arg4[%c0_16, %c0_17] : memref<2x128xi32, #tpu.memory_space<vmem>>, vector<2x128xi32>
    tpu.vector_store %arg4[%c0_16, %c0_17], %53 {strides = array<i32>} : memref<2x128xi32, #tpu.memory_space<vmem>>, vector<2x128xi32>,
    return
  }
  func.func @transform_0(%arg0: i32) -> (i32, i32) {
    %c0_i32 = arith.constant 0 : i32
    %c0_i32_0 = arith.constant 0 : i32
    return %arg0, %c0_i32 : i32, i32
  }
  func.func @transform_1(%arg0: i32) -> (i32, i32) {
    %c0_i32 = arith.constant 0 : i32
    %c0_i32_0 = arith.constant 0 : i32
    %c0_i32_1 = arith.constant 0 : i32
    return %c0_i32, %c0_i32_0 : i32, i32
  }
  func.func @transform_2(%arg0: i32) -> (i32, i32) {
    %c0_i32 = arith.constant 0 : i32
    %c0_i32_0 = arith.constant 0 : i32
    return %c0_i32, %arg0 : i32, i32
  }
  func.func @transform_3(%arg0: i32) -> (i32, i32) {
    %c0_i32 = arith.constant 0 : i32
    %c0_i32_0 = arith.constant 0 : i32
    return %c0_i32, %arg0 : i32, i32
  }
}

</mosaic_0001>

<bundles_post_ra>
// kernel: tpu_custom_call.1
= control target key start
LH: loop header
LB: loop body
LE: loop exit
PB: predicated region body
PF: predicated region fallthrough
CT: control target
= control target key end

     0   :  { %9 = vsyncpa [#allocation3], 0  ;;  %vm39_vm0 = vcmask 261120   ;;  %s1956_s0 = inlined_call_operand.vmem [shape: f32[128,32], index: 0, kind: input, shape index: {}]   ;;  %s1957_s1 = inlined_call_operand.vmem [shape: f32[32,256], index: 1, kind: input, shape index: {}]   ;;  %s1958_s2 = inlined_call_operand.hbm [shape: f32[2,128], index: 2, kind: output, shape index: {0}]   ;;  %s1959_s3 = inlined_call_operand.hbm [shape: s32[2,128], index: 3, kind: output, shape index: {1}]  }
   0x1   :  { %v38_v0 = vld [vmem:[%s1957_s1 + $0x38] sm:$0xff]  ;;  %v36_v1 = vld [vmem:[%s1957_s1 + $0x28] sm:$0xff]  ;;  %v37_v3 = vld [vmem:[%s1957_s1 + $0x30] sm:$0xff] }
   0x2   :  { %165 = vmatpush.msra.mxu1 %v38_v0  ;;  %975 = vmatpush.msra.mxu3 %v38_v0  ;;  %v34_v2 = vld [vmem:[%s1957_s1 + $0x18] sm:$0xff]  ;;  %v35_v4 = vld [vmem:[%s1957_s1 + $0x20] sm:$0xff]  ;;  %v32_v5 = vld [vmem:[%s1957_s1 + $0x8] sm:$0xff] }
   0x3   :  { %100 = vmatpush.msra.mxu0 %v37_v3  ;;  %971 = vmatpush.msra.mxu2 %v37_v3  ;;  %v15_v6 = vld [vmem:[%s1956_s0] sm:$0xff] }
   0x4   :  { %166 = vmatpush.msra.mxu1 %v36_v1  ;;  %976 = vmatpush.msra.mxu3 %v36_v1  ;;  %v23_v7 = vld [vmem:[%s1956_s0 + $0x40] sm:$0xff] }
   0x6   :  { %167 = vmatpush.msra.mxu1 %v34_v2  ;;  %977 = vmatpush.msra.mxu3 %v34_v2 }
   0x7   :  { %10 = vsyncpa [#allocation5], 0  ;;  %101 = vmatpush.msra.mxu0 %v35_v4  ;;  %v33_v8 = vld [vmem:[%s1957_s1 + $0x10] sm:$0xff]  ;;  %972 = vmatpush.msra.mxu2 %v35_v4  ;;  %v31_v9 = vld [vmem:[%s1957_s1] sm:$0xff]  ;;  %v474_v43 = vlaneseq  ;;  %s914_s8 = sshll.u32 %s1958_s2, 4  ;;  %s1162_s2 = smov [#allocation4]   ;;  %s915_s8 = int_to_ptr.hbm [resolvable:$true] %s914_s8 }
   0x8   :  { %168 = vmatpush.msra.mxu1 %v32_v5  ;;  %978 = vmatpush.msra.mxu3 %v32_v5  ;;  %v16_v10 = vld [vmem:[%s1956_s0 + $0x8] sm:$0xff]  ;;  %v17_v12 = vld [vmem:[%s1956_s0 + $0x10] sm:$0xff]  ;;  %v18_v14 = vld [vmem:[%s1956_s0 + $0x18] sm:$0xff]  ;;  %s923_s1 = sshll.u32 %s1162_s2, 4  ;;  %s925_s11 = sshll.u32 %s1959_s3, 4  ;;  %s924_s1 = int_to_ptr.vmem [resolvable:$true] %s923_s1  ;;  %s926_s11 = int_to_ptr.hbm [resolvable:$true] %s925_s11 }
   0x9   :  { %955 = vmatmul.msk.f32.vlgmr.msra.gmra.mxu1 %vm39_vm0, %v15_v6  ;;  %963 = vmatmul.msk.f32.vlgmr.msra.gmra.mxu3 %vm39_vm0, %v23_v7  ;;  %v24_v11 = vld [vmem:[%s1956_s0 + $0x48] sm:$0xff]  ;;  %v25_v13 = vld [vmem:[%s1956_s0 + $0x50] sm:$0xff]  ;;  %v26_v15 = vld [vmem:[%s1956_s0 + $0x58] sm:$0xff]  ;;  %v1301_v52 = vand.u32 127, %v474_v43 }
   0xa   :  { %102 = vmatpush.msra.mxu0 %v33_v8  ;;  %973 = vmatpush.msra.mxu2 %v33_v8  ;;  %v19_v16 = vld [vmem:[%s1956_s0 + $0x20] sm:$0xff]  ;;  %v20_v18 = vld [vmem:[%s1956_s0 + $0x28] sm:$0xff]  ;;  %v21_v20 = vld [vmem:[%s1956_s0 + $0x30] sm:$0xff] }
   0xb   :  { %v27_v17 = vld [vmem:[%s1956_s0 + $0x60] sm:$0xff]  ;;  %v28_v19 = vld [vmem:[%s1956_s0 + $0x68] sm:$0xff]  ;;  %v29_v21 = vld [vmem:[%s1956_s0 + $0x70] sm:$0xff]  ;;  %vm476_vm2 = vcmp.lt.s32.totalorder %v1301_v52, 16 }
   0xc   :  { %103 = vmatpush.msra.mxu0 %v31_v9  ;;  %974 = vmatpush.msra.mxu2 %v31_v9  ;;  %v22_v22 = vld [vmem:[%s1956_s0 + $0x38] sm:$0xff] }
   0xd   :  { %939 = vmatmul.msk.f32.vlgmr.msra.gmra.mxu0 %vm39_vm0, %v15_v6  ;;  %947 = vmatmul.msk.f32.vlgmr.msra.gmra.mxu2 %vm39_vm0, %v23_v7  ;;  %v30_v23 = vld [vmem:[%s1956_s0 + $0x78] sm:$0xff]  ;;  %s1161_s0 = smov [#allocation2]  }
   0xe   :  { %s912_s5 = sshll.u32 %s1161_s0, 4  ;;  %s913_s5 = int_to_ptr.vmem [resolvable:$true] %s912_s5 }
  0x11   :  { %956 = vmatmul.msk.f32.gmra.mxu1 %vm39_vm0, %v16_v10  ;;  %964 = vmatmul.msk.f32.gmra.mxu3 %vm39_vm0, %v24_v11 }
  0x15   :  { %940 = vmatmul.msk.f32.gmra.mxu0 %vm39_vm0, %v16_v10  ;;  %948 = vmatmul.msk.f32.gmra.mxu2 %vm39_vm0, %v24_v11 }
  0x19   :  { %957 = vmatmul.msk.f32.gmra.mxu1 %vm39_vm0, %v17_v12  ;;  %965 = vmatmul.msk.f32.gmra.mxu3 %vm39_vm0, %v25_v13 }
  0x1d   :  { %941 = vmatmul.msk.f32.gmra.mxu0 %vm39_vm0, %v17_v12  ;;  %949 = vmatmul.msk.f32.gmra.mxu2 %vm39_vm0, %v25_v13 }
  0x21   :  { %958 = vmatmul.msk.f32.gmra.mxu1 %vm39_vm0, %v18_v14  ;;  %966 = vmatmul.msk.f32.gmra.mxu3 %vm39_vm0, %v26_v15 }
  0x25   :  { %942 = vmatmul.msk.f32.gmra.mxu0 %vm39_vm0, %v18_v14  ;;  %950 = vmatmul.msk.f32.gmra.mxu2 %vm39_vm0, %v26_v15 }
  0x29   :  { %959 = vmatmul.msk.f32.gmra.mxu1 %vm39_vm0, %v19_v16  ;;  %967 = vmatmul.msk.f32.gmra.mxu3 %vm39_vm0, %v27_v17 }
  0x2d   :  { %943 = vmatmul.msk.f32.gmra.mxu0 %vm39_vm0, %v19_v16  ;;  %951 = vmatmul.msk.f32.gmra.mxu2 %vm39_vm0, %v27_v17 }
  0x31   :  { %960 = vmatmul.msk.f32.gmra.mxu1 %vm39_vm0, %v20_v18  ;;  %968 = vmatmul.msk.f32.gmra.mxu3 %vm39_vm0, %v28_v19 }
  0x35   :  { %944 = vmatmul.msk.f32.gmra.mxu0 %vm39_vm0, %v20_v18  ;;  %952 = vmatmul.msk.f32.gmra.mxu2 %vm39_vm0, %v28_v19 }
  0x39   :  { %961 = vmatmul.msk.f32.gmra.mxu1 %vm39_vm0, %v21_v20  ;;  %969 = vmatmul.msk.f32.gmra.mxu3 %vm39_vm0, %v29_v21 }
  0x3d   :  { %945 = vmatmul.msk.f32.gmra.mxu0 %vm39_vm0, %v21_v20  ;;  %953 = vmatmul.msk.f32.gmra.mxu2 %vm39_vm0, %v29_v21 }
  0x41   :  { %962 = vmatmul.msk.f32.gmra.mxu1 %vm39_vm0, %v22_v22  ;;  %970 = vmatmul.msk.f32.gmra.mxu3 %vm39_vm0, %v30_v23 }
  0x45   :  { %946 = vmatmul.msk.f32.gmra.mxu0 %vm39_vm0, %v22_v22  ;;  %954 = vmatmul.msk.f32.gmra.mxu2 %vm39_vm0, %v30_v23 }
  0x86   :  { %v170_v24 = vpop.f32.mrf.mxu1 }
  0x87   :  { %v234_v25 = vand.u32 2147483647, %v170_v24  ;;  %v218_v57 = vmax.f32 %v170_v24, 0.0 }
  0x89   :  { %v250_v26 = vsub.f32 0.0, %v234_v25 }
  0x8a   :  { %v105_v33 = vpop.f32.mrf.mxu0 }
  0x8b   :  { %v266_v27 = vmul.f32 1.442695, %v250_v26 }
  0x8c   :  { %v1287_v28 = vpop.f32.mrf.mxu3 }
  0x8d   :  { %981 = vpow2.f32 %v266_v27  ;;  %v242_v31 = vand.u32 2147483647, %v1287_v28 }
  0x8e   :  { %v1289_v29 = vpop.f32.mrf.mxu1 }
  0x8f   :  { %v235_v30 = vand.u32 2147483647, %v1289_v29  ;;  %v258_v36 = vsub.f32 0.0, %v242_v31  ;;  %v219_v8 = vmax.f32 %v1289_v29, 0.0 }
  0x90   :  { %v1306_v61 = vpop.f32.mrf.mxu2 }
  0x91   :  { %v251_v32 = vsub.f32 0.0, %v235_v30  ;;  %v282_v42 = vmul.f32 1.442695, %v258_v36 }
  0x92   :  { %v108_v49 = vpop.f32.mrf.mxu0 }
  0x93   :  { %v982_v34 = vpop.eup %981  ;;  %v268_v35 = vmul.f32 1.442695, %v251_v32 }
  0x94   :  { %v1293_v37 = vpop.f32.mrf.mxu3  ;;  %v298_v38 = vadd.f32 1.0, %v982_v34  ;;  %v301_v39 = vmul.f32 -0.5, %v982_v34  ;;  %v304_v46 = vand.u32 2147483647, %v982_v34 }
  0x95   :  { %983 = vpow2.f32 %v268_v35  ;;  %v243_v62 = vand.u32 2147483647, %v1293_v37 }
  0x96   :  { %v1295_v40 = vpop.f32.mrf.mxu1  ;;  %985 = vlog2.f32 %v298_v38  ;;  %v302_v45 = vadd.f32 1.0, %v301_v39  ;;  %vm305_vm1 = vcmp.lt.f32.partialorder %v304_v46, 0.0004427343 }
  0x97   :  { %v236_v41 = vand.u32 2147483647, %v1295_v40  ;;  %987 = vpow2.f32 %v282_v42  ;;  %v259_v9 = vsub.f32 0.0, %v243_v62 }
  0x98   :  { %v303_v55 = vmul.f32 %v982_v34, %v302_v45  ;;  %v1327_v29 = vpop.f32.mrf.mxu2  ;;  %v220_v34 = vmax.f32 %v1295_v40, 0.0 }
  0x99   :  { %v252_v44 = vsub.f32 0.0, %v236_v41  ;;  %v284_v23 = vmul.f32 1.442695, %v259_v9 }
  0x9a   :  { %v111_v15 = vpop.f32.mrf.mxu0 }
  0x9b   :  { %v984_v47 = vpop.eup %983  ;;  %v270_v48 = vmul.f32 1.442695, %v252_v44 }
  0x9c   :  { %v986_v50 = vpop.eup %985  ;;  %v1298_v51 = vpop.f32.mrf.mxu3  ;;  %v307_v53 = vadd.f32 1.0, %v984_v47  ;;  %v310_v56 = vmul.f32 -0.5, %v984_v47  ;;  %v313_v4 = vand.u32 2147483647, %v984_v47 }
  0x9d   :  { %989 = vpow2.f32 %v270_v48  ;;  %v300_v54 = vmul.f32 0.6931472, %v986_v50  ;;  %v1310_v2 = vpop.eup %987  ;;  %v244_v20 = vand.u32 2147483647, %v1298_v51 }
  0x9e   :  { %v1303_v58 = vpop.f32.mrf.mxu1  ;;  %991 = vlog2.f32 %v307_v53  ;;  %v311_v1 = vadd.f32 1.0, %v310_v56  ;;  %vm314_vm3 = vcmp.lt.f32.partialorder %v313_v4, 0.0004427343  ;;  %v370_v19 = vadd.f32 1.0, %v1310_v2 }
  0x9f   :  { %v237_v59 = vand.u32 2147483647, %v1303_v58  ;;  %v306_v60 = vsel %vm305_vm1, %v303_v55, %v300_v54  ;;  %v373_v26 = vmul.f32 -0.5, %v1310_v2  ;;  %v260_v35 = vsub.f32 0.0, %v244_v20 }
  0xa0   :  { %v442_v63 = vadd.f32 %v306_v60, %v218_v57  ;;  %v312_v14 = vmul.f32 %v984_v47, %v311_v1  ;;  %v376_v39 = vand.u32 2147483647, %v1310_v2 }
  0xa1   :  { %v253_v0 = vsub.f32 0.0, %v237_v59  ;;  %v374_v45 = vadd.f32 1.0, %v373_v26  ;;  %v286_v50 = vmul.f32 1.442695, %v260_v35 }
  0xa2   :  { %v458_v3 = vadd.f32 %v442_v63, %v105_v33  ;;  %v114_v55 = vpop.f32.mrf.mxu0  ;;  %vm1345_vm5 = vcmp.lt.f32.partialorder %v376_v39, 0.0004427343 }
  0xa3   :  { %v990_v5 = vpop.eup %989  ;;  %v272_v6 = vmul.f32 1.442695, %v253_v0  ;;  %v375_v60 = vmul.f32 %v1310_v2, %v374_v45 }
  0xa4   :  { %v992_v7 = vpop.eup %991  ;;  %v1315_v10 = vsel %vm476_vm2, %v458_v3, -inf  ;;  %v1317_v11 = vpop.f32.mrf.mxu3  ;;  %v316_v12 = vadd.f32 1.0, %v990_v5  ;;  %v319_v16 = vmul.f32 -0.5, %v990_v5  ;;  %v322_v32 = vand.u32 2147483647, %v990_v5 }
  0xa5   :  { %993 = vpow2.f32 %v272_v6  ;;  %493 = vmax.xlane.f32.xlu0 %v1315_v10  ;;  %v309_v13 = vmul.f32 0.6931472, %v992_v7  ;;  %v245_v18 = vand.u32 2147483647, %v1317_v11 }
  0xa6   :  { %v1320_v17 = vpop.f32.mrf.mxu1  ;;  %995 = vlog2.f32 %v316_v12  ;;  %v320_v27 = vadd.f32 1.0, %v319_v16  ;;  %vm323_vm4 = vcmp.lt.f32.partialorder %v322_v32, 0.0004427343  ;;  %v229_v32 = vmax.f32 %v1317_v11, 0.0 }
  0xa7   :  { %v238_v21 = vand.u32 2147483647, %v1320_v17  ;;  %v315_v22 = vsel %vm314_vm3, %v312_v14, %v309_v13  ;;  %v261_v30 = vsub.f32 0.0, %v245_v18  ;;  %997 = vlog2.f32 %v370_v19 }
  0xa8   :  { %v443_v24 = vadd.f32 %v315_v22, %v219_v8  ;;  %999 = vpow2.f32 %v284_v23  ;;  %v321_v47 = vmul.f32 %v990_v5, %v320_v27  ;;  %v1349_v8 = vpop.f32.mrf.mxu2  ;;  %v221_v18 = vmax.f32 %v1303_v58, 0.0 }
  0xa9   :  { %v254_v25 = vsub.f32 0.0, %v238_v21  ;;  %v288_v40 = vmul.f32 1.442695, %v261_v30  ;;  %v227_v58 = vmax.f32 %v1293_v37, 0.0 }
  0xaa   :  { %v459_v31 = vadd.f32 %v443_v24, %v108_v49 }
  0xab   :  { %v994_v33 = vpop.eup %993  ;;  %v274_v36 = vmul.f32 1.442695, %v254_v25 }
  0xac   :  { %v996_v38 = vpop.eup %995  ;;  %v1333_v41 = vsel %vm476_vm2, %v459_v31, -inf  ;;  %v1335_v42 = vpop.f32.mrf.mxu3  ;;  %v325_v44 = vadd.f32 1.0, %v994_v33  ;;  %v328_v49 = vmul.f32 -0.5, %v994_v33  ;;  %v331_v7 = vand.u32 2147483647, %v994_v33 }
  0xad   :  { %1001 = vpow2.f32 %v274_v36  ;;  %495 = vmax.xlane.f32.xlu0 %v1333_v41  ;;  %v318_v46 = vmul.f32 0.6931472, %v996_v38  ;;  %v998_v56 = vpop.eup %997  ;;  %v246_v57 = vand.u32 2147483647, %v1335_v42  ;;  %v117_v36 = vpop.f32.mrf.mxu0  ;;  %v222_v38 = vmax.f32 %v1320_v17, 0.0 }
  0xae   :  { %v1338_v48 = vpop.f32.mrf.mxu1  ;;  %1003 = vlog2.f32 %v325_v44  ;;  %v1343_v63 = vpop.eup %999  ;;  %v329_v3 = vadd.f32 1.0, %v328_v49  ;;  %v372_v5 = vmul.f32 0.6931472, %v998_v56  ;;  %vm332_vm6 = vcmp.lt.f32.partialorder %v331_v7, 0.0004427343 }
  0xaf   :  { %v239_v53 = vand.u32 2147483647, %v1338_v48  ;;  %v324_v54 = vsel %vm323_vm4, %v321_v47, %v318_v46  ;;  %1005 = vpow2.f32 %v288_v40  ;;  %v262_v12 = vsub.f32 0.0, %v246_v57 }
  0xb0   :  { %v444_v59 = vadd.f32 %v324_v54, %v220_v34  ;;  %1007 = vpow2.f32 %v286_v50  ;;  %v379_v19 = vadd.f32 1.0, %v1343_v63  ;;  %v330_v22 = vmul.f32 %v994_v33, %v329_v3 }
  0xb1   :  { %v255_v62 = vsub.f32 0.0, %v239_v53  ;;  %v378_v23 = vsel %vm1345_vm5, %v375_v60, %v372_v5  ;;  %v382_v24 = vmul.f32 -0.5, %v1343_v63  ;;  %v290_v26 = vmul.f32 1.442695, %v262_v12  ;;  %v1383_v60 = vpop.f32.mrf.mxu2 }
  0xb2   :  { %v460_v1 = vadd.f32 %v444_v59, %v111_v15  ;;  %v226_v15 = vmax.f32 %v1287_v28, 0.0  ;;  %v385_v33 = vand.u32 2147483647, %v1343_v63 }
  0xb3   :  { %v1002_v4 = vpop.eup %1001  ;;  %v276_v6 = vmul.f32 1.442695, %v255_v62  ;;  %v383_v46 = vadd.f32 1.0, %v382_v24 }
  0xb4   :  { %v1004_v9 = vpop.eup %1003  ;;  %v1353_v2 = vsel %vm476_vm2, %v460_v1, -inf  ;;  %v1355_v13 = vpop.f32.mrf.mxu3  ;;  %v334_v14 = vadd.f32 1.0, %v1002_v4  ;;  %v337_v16 = vmul.f32 -0.5, %v1002_v4  ;;  %v450_v39 = vadd.f32 %v378_v23, %v226_v15 }
  0xb5   :  { %1009 = vpow2.f32 %v276_v6  ;;  %497 = vmax.xlane.f32.xlu1 %v1353_v2  ;;  %v327_v21 = vmul.f32 0.6931472, %v1004_v9  ;;  %v1367_v28 = vpop.eup %1005  ;;  %v340_v44 = vand.u32 2147483647, %v1002_v4  ;;  %v247_v53 = vand.u32 2147483647, %v1355_v13 }
  0xb6   :  { %v1361_v20 = vpop.f32.mrf.mxu1  ;;  %1011 = vlog2.f32 %v334_v14  ;;  %v338_v30 = vadd.f32 1.0, %v337_v16  ;;  %v1370_v31 = vpop.eup %1007  ;;  %v397_v49 = vadd.f32 1.0, %v1367_v28  ;;  %v400_v6 = vmul.f32 -0.5, %v1367_v28 }
  0xb7   :  { %v240_v25 = vand.u32 2147483647, %v1361_v20  ;;  %v333_v27 = vsel %vm332_vm6, %v330_v22, %v327_v21  ;;  %1013 = vlog2.f32 %v379_v19  ;;  %vm341_vm7 = vcmp.lt.f32.partialorder %v340_v44, 0.0004427343 }
  0xb8   :  { %v445_v35 = vadd.f32 %v333_v27, %v221_v18  ;;  %1015 = vpow2.f32 %v290_v26  ;;  %v339_v54 = vmul.f32 %v1002_v4, %v338_v30  ;;  %v388_v3 = vadd.f32 1.0, %v1370_v31 }
  0xb9   :  { %v256_v34 = vsub.f32 0.0, %v240_v25  ;;  %vm1395_vm8 = vcmp.lt.f32.partialorder %v385_v33, 0.0004427343  ;;  %v391_v12 = vmul.f32 -0.5, %v1370_v31  ;;  %v1401_v15 = vmul.f32 %v1343_v63, %v383_v46 }
  0xba   :  { %v461_v40 = vadd.f32 %v445_v35, %v114_v55  ;;  %v1386_v55 = vadd.f32 %v450_v39, %v1306_v61  ;;  %v263_v61 = vsub.f32 0.0, %v247_v53  ;;  %v394_v22 = vand.u32 2147483647, %v1370_v31  ;;  %v120_v35 = vpop.f32.mrf.mxu0 }
  0xbb   :  { %v1010_v45 = vpop.eup %1009  ;;  %v278_v47 = vmul.f32 1.442695, %v256_v34  ;;  %v223_v27 = vmax.f32 %v1338_v48, 0.0  ;;  %v401_v34 = vadd.f32 1.0, %v400_v6  ;;  %v403_v53 = vand.u32 2147483647, %v1367_v28 }
  0xbc   :  { %v1012_v50 = vpop.eup %1011  ;;  %v1377_v56 = vpop.f32.mrf.mxu3  ;;  %v343_v57 = vadd.f32 1.0, %v1010_v45  ;;  %v1381_v17 = vsel %vm476_vm2, %v461_v40, -inf  ;;  %v346_v62 = vmul.f32 -0.5, %v1010_v45  ;;  %v349_v25 = vand.u32 2147483647, %v1010_v45 }
  0xbd   :  { %1017 = vpow2.f32 %v278_v47  ;;  %v336_v59 = vmul.f32 0.6931472, %v1012_v50  ;;  %499 = vmax.xlane.f32.xlu1 %v1381_v17  ;;  %v248_v1 = vand.u32 2147483647, %v1377_v56  ;;  %v1014_v7 = vpop.eup %1013  ;;  %vm1428_vm10 = vcmp.lt.f32.partialorder %v403_v53, 0.0004427343 }
  0xbe   :  { %v1389_v0 = vpop.f32.mrf.mxu1  ;;  %1019 = vlog2.f32 %v343_v57  ;;  %v347_v19 = vadd.f32 1.0, %v346_v62  ;;  %v1403_v21 = vpop.eup %1015  ;;  %v1407_v30 = vmul.f32 0.6931472, %v1014_v7  ;;  %vm350_vm9 = vcmp.lt.f32.partialorder %v349_v25, 0.0004427343 }
  0xbf   :  { %v241_v4 = vand.u32 2147483647, %v1389_v0  ;;  %v342_v5 = vsel %vm341_vm7, %v339_v54, %v336_v59  ;;  %v264_v16 = vsub.f32 0.0, %v248_v1  ;;  %1021 = vlog2.f32 %v397_v49  ;;  %v1419_v57 = vpop.f32.mrf.mxu2 }
  0xc0   :  { %v446_v14 = vadd.f32 %v342_v5, %v222_v38  ;;  %v292_v38 = vmul.f32 1.442695, %v263_v61  ;;  %v348_v48 = vmul.f32 %v1010_v45, %v347_v19  ;;  %v406_v40 = vadd.f32 1.0, %v1403_v21 }
  0xc1   :  { %v257_v18 = vsub.f32 0.0, %v241_v4  ;;  %v294_v24 = vmul.f32 1.442695, %v264_v16  ;;  %v230_v62 = vmax.f32 %v1335_v42, 0.0  ;;  %v392_v4 = vadd.f32 1.0, %v391_v12 }
  0xc2   :  { %v462_v23 = vadd.f32 %v446_v14, %v117_v36  ;;  %v402_v5 = vmul.f32 %v1367_v28, %v401_v34  ;;  %v409_v6 = vmul.f32 -0.5, %v1403_v21  ;;  %v387_v19 = vsel %vm1395_vm8, %v1401_v15, %v1407_v30  ;;  %v123_v9 = vpop.f32.mrf.mxu0 }
  0xc3   :  { %v1018_v26 = vpop.eup %1017  ;;  %v280_v33 = vmul.f32 1.442695, %v257_v18  ;;  %1023 = vpow2.f32 %v294_v24  ;;  %v224_v24 = vmax.f32 %v1361_v20, 0.0  ;;  %vm1447_vm12 = vcmp.lt.f32.partialorder %v394_v22, 0.0004427343 }
  0xc4   :  { %v1020_v63 = vpop.eup %1019  ;;  %v1411_v39 = vsel %vm476_vm2, %v462_v23, -inf  ;;  %v1413_v44 = vpop.f32.mrf.mxu3  ;;  %v352_v36 = vadd.f32 1.0, %v1018_v26  ;;  %v355_v49 = vmul.f32 -0.5, %v1018_v26  ;;  %v358_v16 = vand.u32 2147483647, %v1018_v26 }
  0xc5   :  { %1025 = vpow2.f32 %v280_v33  ;;  %501 = vmax.xlane.f32.xlu2 %v1411_v39  ;;  %v345_v46 = vmul.f32 0.6931472, %v1020_v63  ;;  %v249_v47 = vand.u32 2147483647, %v1413_v44  ;;  %v1022_v50 = vpop.eup %1021  ;;  %v410_v20 = vadd.f32 1.0, %v409_v6 }
  0xc6   :  { %1027 = vlog2.f32 %v352_v36  ;;  %v356_v45 = vadd.f32 1.0, %v355_v49  ;;  %v399_v14 = vmul.f32 0.6931472, %v1022_v50  ;;  %vm359_vm11 = vcmp.lt.f32.partialorder %v358_v16, 0.0004427343 }
  0xc7   :  { %1029 = vlog2.f32 %v388_v3  ;;  %v351_v54 = vsel %vm350_vm9, %v348_v48, %v345_v46  ;;  %v265_v59 = vsub.f32 0.0, %v249_v47  ;;  %v1443_v36 = vmul.f32 %v1370_v31, %v392_v4  ;;  %v1456_v31 = vpop.f32.mrf.mxu2 }
  0xc8   :  { %1031 = vpow2.f32 %v292_v38  ;;  %v447_v1 = vadd.f32 %v351_v54, %v223_v27  ;;  %v357_v27 = vmul.f32 %v1018_v26, %v356_v45  ;;  %v405_v38 = vsel %vm1428_vm10, %v402_v5, %v399_v14 }
  0xc9   :  { %v296_v7 = vmul.f32 1.442695, %v265_v59  ;;  %v1024_v61 = vpop.eup %1023  ;;  %1033 = vlog2.f32 %v406_v40  ;;  %v451_v40 = vadd.f32 %v387_v19, %v227_v58  ;;  %v453_v59 = vadd.f32 %v405_v38, %v229_v32 }
  0xca   :  { %v463_v3 = vadd.f32 %v447_v1, %v120_v35  ;;  %v424_v28 = vadd.f32 1.0, %v1024_v61  ;;  %v427_v35 = vmul.f32 -0.5, %v1024_v61  ;;  %v430_v53 = vand.u32 2147483647, %v1024_v61 }
  0xcb   :  { %v1026_v18 = vpop.eup %1025  ;;  %1035 = vpow2.f32 %v296_v7  ;;  %v412_v1 = vand.u32 2147483647, %v1403_v21  ;;  %v411_v4 = vmul.f32 %v1403_v21, %v410_v20  ;;  %v1463_v14 = vsel %vm476_vm2, %v1386_v55, -inf }
  0xcc   :  { %v1028_v12 = vpop.eup %1027  ;;  %v1435_v25 = vsel %vm476_vm2, %v463_v3, -inf  ;;  %v361_v33 = vadd.f32 1.0, %v1026_v18  ;;  %v364_v30 = vmul.f32 -0.5, %v1026_v18  ;;  %1037 = vlog2.f32 %v424_v28 }
  0xcd   :  { %v1030_v34 = vpop.eup %1029  ;;  %503 = vmax.xlane.f32.xlu2 %v1435_v25  ;;  %v354_v15 = vmul.f32 0.6931472, %v1028_v12  ;;  %v428_v48 = vadd.f32 1.0, %v427_v35  ;;  %v367_v6 = vand.u32 2147483647, %v1026_v18  ;;  %v225_v28 = vmax.f32 %v1389_v0, 0.0 }
  0xce   :  { %v1438_v63 = vpop.eup %1031  ;;  %1039 = vlog2.f32 %v361_v33  ;;  %v390_v49 = vmul.f32 0.6931472, %v1030_v34  ;;  %v365_v45 = vadd.f32 1.0, %v364_v30  ;;  %vm1469_vm13 = vcmp.lt.f32.partialorder %v430_v53, 0.0004427343  ;;  %v126_v33 = vpop.f32.mrf.mxu0 }
  0xcf   :  { %v360_v46 = vsel %vm359_vm11, %v357_v27, %v354_v15  ;;  %v1034_v47 = vpop.eup %1033  ;;  %v415_v22 = vadd.f32 1.0, %v1438_v63  ;;  %v429_v11 = vmul.f32 %v1024_v61, %v428_v48  ;;  %vm1473_vm14 = vcmp.lt.f32.partialorder %v412_v1, 0.0004427343  ;;  %v147_v38 = vpop.f32.mrf.mxu2 }
  0xd0   :  { %v448_v50 = vadd.f32 %v360_v46, %v224_v24  ;;  %v408_v7 = vmul.f32 0.6931472, %v1034_v47  ;;  %v366_v61 = vmul.f32 %v1026_v18, %v365_v45  ;;  %v232_v12 = vmax.f32 %v1377_v56, 0.0 }
  0xd1   :  { %v1036_v54 = vpop.eup %1035  ;;  %v418_v24 = vmul.f32 -0.5, %v1438_v63  ;;  %vm368_vm15 = vcmp.lt.f32.partialorder %v367_v6, 0.0004427343  ;;  %v467_v27 = vadd.f32 %v451_v40, %v1327_v29  ;;  %v469_v30 = vadd.f32 %v453_v59, %v1383_v60 }
  0xd2   :  { %v464_v5 = vadd.f32 %v448_v50, %v123_v9  ;;  %v433_v37 = vadd.f32 1.0, %v1036_v54  ;;  %v1038_v58 = vpop.eup %1037  ;;  %v436_v32 = vmul.f32 -0.5, %v1036_v54  ;;  %v414_v18 = vsel %vm1473_vm14, %v411_v4, %v408_v7 }
  0xd3   :  { %v426_v19 = vmul.f32 0.6931472, %v1038_v58  ;;  %v439_v0 = vand.u32 2147483647, %v1036_v54  ;;  %v228_v56 = vmax.f32 %v1298_v51, 0.0  ;;  %v396_v29 = vsel %vm1447_vm12, %v1443_v36, %v390_v49 }
  0xd4   :  { %v1040_v3 = vpop.eup %1039  ;;  %v1467_v16 = vsel %vm476_vm2, %v464_v5, -inf  ;;  %1041 = vlog2.f32 %v433_v37  ;;  %v437_v15 = vadd.f32 1.0, %v436_v32  ;;  %v419_v46 = vadd.f32 1.0, %v418_v24 }
  0xd5   :  { %1043 = vlog2.f32 %v415_v22  ;;  %509 = vmax.xlane.f32.xlu2 %v1463_v14  ;;  %505 = vmax.xlane.f32.xlu0 %v1467_v16  ;;  %v363_v55 = vmul.f32 0.6931472, %v1040_v3  ;;  %v432_v9 = vsel %vm1469_vm13, %v429_v11, %v426_v19  ;;  %v454_v60 = vadd.f32 %v414_v18, %v230_v62 }
  0xd6   :  { %v456_v47 = vadd.f32 %v432_v9, %v232_v12  ;;  %v421_v50 = vand.u32 2147483647, %v1438_v63  ;;  %v438_v59 = vmul.f32 %v1036_v54, %v437_v15  ;;  %v1497_v51 = vsel %vm476_vm2, %v469_v30, -inf }
  0xd7   :  { %v369_v34 = vsel %vm368_vm15, %v366_v61, %v363_v55  ;;  %v1501_v1 = vsel %vm476_vm2, %v467_v27, -inf  ;;  %vm1507_vm0 = vcmp.lt.f32.partialorder %v439_v0, 0.0004427343  ;;  %v452_v42 = vadd.f32 %v396_v29, %v228_v56 }
  0xd8   :  { %v449_v35 = vadd.f32 %v369_v34, %v225_v28  ;;  %v233_v62 = vmax.f32 %v1413_v44, 0.0  ;;  %v420_v54 = vmul.f32 %v1438_v63, %v419_v46  ;;  %v472_v22 = vadd.f32 %v456_v47, %v147_v38  ;;  %v150_v63 = vpop.f32.mrf.mxu2 }
  0xd9   :  { %vm422_vm1 = vcmp.lt.f32.partialorder %v421_v50, 0.0004427343  ;;  %v470_v4 = vadd.f32 %v454_v60, %v1419_v57  ;;  %v231_v5 = vmax.f32 %v1355_v13, 0.0  ;;  %v468_v6 = vadd.f32 %v452_v42, %v1349_v8 }
  0xda   :  { %v1042_v20 = vpop.eup %1041  ;;  %v465_v48 = vadd.f32 %v449_v35, %v126_v33  ;;  %v1523_v44 = vsel %vm476_vm2, %v472_v22, -inf }
  0xdb   :  { %v1044_v40 = vpop.eup %1043  ;;  %v435_v53 = vmul.f32 0.6931472, %v1042_v20  ;;  %v1527_v7 = vsel %vm476_vm2, %v470_v4, -inf  ;;  %v1533_v13 = vsel %vm476_vm2, %v468_v6, -inf }
  0xdc   :  { %v1505_v36 = vsel %vm476_vm2, %v465_v48, -inf  ;;  %v417_v49 = vmul.f32 0.6931472, %v1044_v40 }
  0xdd   :  { %515 = vmax.xlane.f32.xlu2 %v1497_v51  ;;  %511 = vmax.xlane.f32.xlu0 %v1501_v1  ;;  %v441_v45 = vsel %vm1507_vm0, %v438_v59, %v435_v53 }
  0xde   :  { %507 = vmax.xlane.f32.xlu1 %v1505_v36  ;;  %v423_v37 = vsel %vm422_vm1, %v420_v54, %v417_v49  ;;  %v457_v58 = vadd.f32 %v441_v45, %v233_v62 }
  0xdf   :  { %v455_v11 = vadd.f32 %v423_v37, %v231_v5 }
  0xe0   :  { %v473_v8 = vadd.f32 %v457_v58, %v150_v63 }
  0xe1   :  { %v471_v57 = vadd.f32 %v455_v11, %v1456_v31 }
  0xe2   :  { %v1539_v32 = vsel %vm476_vm2, %v473_v8, -inf }
  0xe3   :  { %v1544_v3 = vsel %vm476_vm2, %v471_v57, -inf }
  0xe5   :  { %521 = vmax.xlane.f32.xlu2 %v1523_v44  ;;  %517 = vmax.xlane.f32.xlu0 %v1527_v7 }
  0xe6   :  { %513 = vmax.xlane.f32.xlu1 %v1533_v13 }
  0xed   :  { %523 = vmax.xlane.f32.xlu0 %v1539_v32 }
  0xee   :  { %519 = vmax.xlane.f32.xlu1 %v1544_v3 }
 0x118   :  { %v494_v19 = vpop.xlane.xlu0 %493 }
 0x119   :  { %v525_v21 = vsub.f32 %v1315_v10, %v494_v19 }
 0x11b   :  { %v541_v23 = vmul.f32 1.442695, %v525_v21 }
 0x11d   :  { %1045 = vpow2.f32 %v541_v23 }
 0x120   :  { %v496_v55 = vpop.xlane.xlu0 %495 }
 0x121   :  { %v526_v31 = vsub.f32 %v1333_v41, %v496_v55 }
 0x123   :  { %v1549_v61 = vpop.eup %1045  ;;  %v543_v28 = vmul.f32 1.442695, %v526_v31 }
 0x124   :  { %573 = vadd.xlane.f32.xlu1 %v1549_v61 }
 0x125   :  { %1047 = vpow2.f32 %v543_v28 }
 0x128   :  { %v498_v12 = vpop.xlane.xlu1 %497 }
 0x129   :  { %v527_v52 = vsub.f32 %v1353_v2, %v498_v12 }
 0x12b   :  { %v1553_v24 = vpop.eup %1047  ;;  %v545_v27 = vmul.f32 1.442695, %v527_v52 }
 0x12c   :  { %575 = vadd.xlane.f32.xlu2 %v1553_v24 }
 0x12d   :  { %1049 = vpow2.f32 %v545_v27 }
 0x130   :  { %v500_v10 = vpop.xlane.xlu1 %499 }
 0x131   :  { %v528_v33 = vsub.f32 %v1381_v17, %v500_v10 }
 0x133   :  { %v1557_v34 = vpop.eup %1049  ;;  %v547_v41 = vmul.f32 1.442695, %v528_v33 }
 0x134   :  { %577 = vadd.xlane.f32.xlu0 %v1557_v34 }
 0x135   :  { %1051 = vpow2.f32 %v547_v41 }
 0x138   :  { %v502_v9 = vpop.xlane.xlu2 %501 }
 0x139   :  { %v529_v15 = vsub.f32 %v1411_v39, %v502_v9 }
 0x13b   :  { %v549_v30 = vmul.f32 1.442695, %v529_v15  ;;  %v1561_v2 = vpop.eup %1051 }
 0x13c   :  { %579 = vadd.xlane.f32.xlu1 %v1561_v2 }
 0x13d   :  { %1053 = vpow2.f32 %v549_v30 }
 0x140   :  { %v504_v18 = vpop.xlane.xlu2 %503 }
 0x141   :  { %v530_v35 = vsub.f32 %v1435_v25, %v504_v18 }
 0x143   :  { %v1565_v0 = vpop.eup %1053  ;;  %v551_v17 = vmul.f32 1.442695, %v530_v35 }
 0x144   :  { %581 = vadd.xlane.f32.xlu2 %v1565_v0 }
 0x145   :  { %1055 = vpow2.f32 %v551_v17 }
 0x148   :  { %v510_v56 = vpop.xlane.xlu2 %509  ;;  %v506_v38 = vpop.xlane.xlu0 %505 }
 0x149   :  { %v533_v20 = vsub.f32 %v1463_v14, %v510_v56  ;;  %v531_v39 = vsub.f32 %v1467_v16, %v506_v38 }
 0x14b   :  { %v1570_v29 = vpop.eup %1055  ;;  %v557_v46 = vmul.f32 1.442695, %v533_v20  ;;  %v553_v48 = vmul.f32 1.442695, %v531_v39 }
 0x14c   :  { %583 = vadd.xlane.f32.xlu0 %v1570_v29 }
 0x14d   :  { %1057 = vpow2.f32 %v557_v46 }
 0x14e   :  { %1059 = vpow2.f32 %v553_v48 }
 0x150   :  { %v516_v25 = vpop.xlane.xlu2 %515  ;;  %v512_v47 = vpop.xlane.xlu0 %511 }
 0x151   :  { %v536_v40 = vsub.f32 %v1497_v51, %v516_v25  ;;  %v534_v60 = vsub.f32 %v1501_v1, %v512_v47  ;;  %v508_v50 = vpop.xlane.xlu1 %507 }
 0x152   :  { %v532_v57 = vsub.f32 %v1505_v36, %v508_v50 }
 0x153   :  { %v1575_v53 = vpop.eup %1057  ;;  %v563_v14 = vmul.f32 1.442695, %v536_v40  ;;  %v559_v59 = vmul.f32 1.442695, %v534_v60 }
 0x154   :  { %v1577_v16 = vpop.eup %1059  ;;  %589 = vadd.xlane.f32.xlu0 %v1575_v53 }
 0x155   :  { %1061 = vpow2.f32 %v563_v14  ;;  %585 = vadd.xlane.f32.xlu1 %v1577_v16 }
 0x156   :  { %1063 = vpow2.f32 %v559_v59 }
 0x158   :  { %v522_v26 = vpop.xlane.xlu2 %521  ;;  %v518_v42 = vpop.xlane.xlu0 %517 }
 0x159   :  { %v539_v62 = vsub.f32 %v1523_v44, %v522_v26  ;;  %v537_v51 = vsub.f32 %v1527_v7, %v518_v42  ;;  %v514_v1 = vpop.xlane.xlu1 %513 }
 0x15a   :  { %v535_v49 = vsub.f32 %v1533_v13, %v514_v1 }
 0x15b   :  { %v1584_v54 = vpop.eup %1061  ;;  %v569_v22 = vmul.f32 1.442695, %v539_v62  ;;  %v565_v45 = vmul.f32 1.442695, %v537_v51 }
 0x15c   :  { %v1586_v4 = vpop.eup %1063  ;;  %v561_v5 = vmul.f32 1.442695, %v535_v49  ;;  %595 = vadd.xlane.f32.xlu0 %v1584_v54 }
 0x15d   :  { %1065 = vpow2.f32 %v569_v22  ;;  %591 = vadd.xlane.f32.xlu1 %v1586_v4 }
 0x15e   :  { %1067 = vpow2.f32 %v565_v45 }
 0x15f   :  { %1069 = vpow2.f32 %v561_v5 }
 0x160   :  { %v524_v6 = vpop.xlane.xlu0 %523 }
 0x161   :  { %v540_v37 = vsub.f32 %v1539_v32, %v524_v6  ;;  %v520_v44 = vpop.xlane.xlu1 %519 }
 0x162   :  { %v538_v58 = vsub.f32 %v1544_v3, %v520_v44  ;;  %v555_v3 = vmul.f32 1.442695, %v532_v57 }
 0x163   :  { %v1592_v63 = vpop.eup %1065  ;;  %v571_v7 = vmul.f32 1.442695, %v540_v37 }
 0x164   :  { %v1594_v11 = vpop.eup %1067  ;;  %v567_v13 = vmul.f32 1.442695, %v538_v58  ;;  %601 = vadd.xlane.f32.xlu0 %v1592_v63 }
 0x165   :  { %v1597_v8 = vpop.eup %1069  ;;  %1071 = vpow2.f32 %v571_v7  ;;  %597 = vadd.xlane.f32.xlu1 %v1594_v11 }
 0x166   :  { %1073 = vpow2.f32 %v567_v13  ;;  %593 = vadd.xlane.f32.xlu2 %v1597_v8 }
 0x167   :  { %1075 = vpow2.f32 %v555_v3 }
 0x16b   :  { %v1602_v32 = vpop.eup %1071 }
 0x16c   :  { %v1604_v19 = vpop.eup %1073 }
 0x16d   :  { %603 = vadd.xlane.f32.xlu1 %v1602_v32  ;;  %v1076_v21 = vpop.eup %1075 }
 0x16e   :  { %599 = vadd.xlane.f32.xlu2 %v1604_v19 }
 0x176   :  { %587 = vadd.xlane.f32.xlu2 %v1076_v21 }
 0x197   :  { %v574_v23 = vpop.xlane.xlu1 %573 }
 0x198   :  { %1077 = vrcp.f32 %v574_v23 }
 0x19e   :  { %v1078_v55 = vpop.eup %1077 }
 0x19f   :  { %v576_v31 = vpop.xlane.xlu2 %575  ;;  %v621_v28 = vmul.f32 %v1078_v55, %v1549_v61 }
 0x1a0   :  { %1079 = vrcp.f32 %v576_v31 }
 0x1a1   :  { %637 = vxpose.xlu2.b32.start [1/16] %v621_v28, 128 }
 0x1a6   :  { %v1080_v36 = vpop.eup %1079 }
 0x1a7   :  { %v578_v12 = vpop.xlane.xlu0 %577  ;;  %v622_v52 = vmul.f32 %v1080_v36, %v1553_v24 }
 0x1a8   :  { %1081 = vrcp.f32 %v578_v12 }
 0x1a9   :  { %638 = vxpose.xlu2.b32.cont [2/16] %v622_v52, 128 }
 0x1ae   :  { %v1082_v27 = vpop.eup %1081 }
 0x1af   :  { %v623_v10 = vmul.f32 %v1082_v27, %v1557_v34  ;;  %v580_v33 = vpop.xlane.xlu1 %579 }
 0x1b0   :  { %1083 = vrcp.f32 %v580_v33 }
 0x1b1   :  { %639 = vxpose.xlu2.b32.cont [3/16] %v623_v10, 128 }
 0x1b6   :  { %v1084_v41 = vpop.eup %1083 }
 0x1b7   :  { %v582_v9 = vpop.xlane.xlu2 %581  ;;  %v624_v15 = vmul.f32 %v1084_v41, %v1561_v2 }
 0x1b8   :  { %1085 = vrcp.f32 %v582_v9 }
 0x1b9   :  { %640 = vxpose.xlu2.b32.cont [4/16] %v624_v15, 128 }
 0x1be   :  { %v1086_v61 = vpop.eup %1085 }
 0x1bf   :  { %v584_v30 = vpop.xlane.xlu0 %583  ;;  %v625_v18 = vmul.f32 %v1086_v61, %v1565_v0 }
 0x1c0   :  { %1087 = vrcp.f32 %v584_v30 }
 0x1c1   :  { %641 = vxpose.xlu2.b32.cont [5/16] %v625_v18, 128 }
 0x1c6   :  { %v1088_v24 = vpop.eup %1087 }
 0x1c7   :  { %v626_v35 = vmul.f32 %v1088_v24, %v1570_v29  ;;  %v590_v39 = vpop.xlane.xlu0 %589 }
 0x1c8   :  { %v586_v17 = vpop.xlane.xlu1 %585 }
 0x1c9   :  { %1089 = vrcp.f32 %v586_v17  ;;  %642 = vxpose.xlu2.b32.cont [6/16] %v626_v35, 128  ;;  %v1672_v17 = vshrl.u32 %v474_v43, 7 }
 0x1cb   :  { %v1690_v43 = vadd.s32 48, %v1672_v17 }
 0x1cf   :  { %v1090_v34 = vpop.eup %1089  ;;  %v596_v60 = vpop.xlane.xlu0 %595 }
 0x1d0   :  { %v627_v56 = vmul.f32 %v1090_v34, %v1577_v16  ;;  %v592_v48 = vpop.xlane.xlu1 %591 }
 0x1d2   :  { %643 = vxpose.xlu2.b32.cont [7/16] %v627_v56, 128 }
 0x1d7   :  { %v602_v62 = vpop.xlane.xlu0 %601 }
 0x1d8   :  { %v598_v59 = vpop.xlane.xlu1 %597 }
 0x1d9   :  { %v594_v38 = vpop.xlane.xlu2 %593 }
 0x1e0   :  { %v604_v49 = vpop.xlane.xlu1 %603 }
 0x1e1   :  { %v600_v20 = vpop.xlane.xlu2 %599 }
 0x1e9   :  { %v588_v2 = vpop.xlane.xlu2 %587 }
 0x1ea   :  { %1091 = vrcp.f32 %v588_v2  ;;  %v1681_v2 = vadd.s32 24, %v1672_v17 }
 0x1eb   :  { %1093 = vrcp.f32 %v590_v39  ;;  %v1684_v39 = vadd.s32 32, %v1672_v17 }
 0x1ec   :  { %1095 = vrcp.f32 %v592_v48  ;;  %v1693_v48 = vadd.s32 56, %v1672_v17 }
 0x1ed   :  { %1097 = vrcp.f32 %v594_v38  ;;  %v1675_v38 = vadd.s32 8, %v1672_v17 }
 0x1ee   :  { %1099 = vrcp.f32 %v596_v60 }
 0x1ef   :  { %1101 = vrcp.f32 %v598_v59  ;;  %v1716_v59 = vadd.s32 112, %v1672_v17 }
 0x1f0   :  { %v1092_v46 = vpop.eup %1091  ;;  %1103 = vrcp.f32 %v600_v20  ;;  %v1678_v20 = vadd.s32 16, %v1672_v17 }
 0x1f1   :  { %v628_v0 = vmul.f32 %v1092_v46, %v1076_v21  ;;  %v1094_v25 = vpop.eup %1093  ;;  %1105 = vrcp.f32 %v602_v62 }
 0x1f2   :  { %v629_v29 = vmul.f32 %v1094_v25, %v1575_v53  ;;  %v1096_v47 = vpop.eup %1095  ;;  %1107 = vrcp.f32 %v604_v49  ;;  %v1696_v25 = vadd.s32 64, %v1672_v17 }
 0x1f3   :  { %644 = vxpose.xlu2.b32.cont [8/16] %v628_v0, 128  ;;  %v630_v40 = vmul.f32 %v1096_v47, %v1586_v4  ;;  %v1098_v50 = vpop.eup %1097  ;;  %v1687_v0 = vadd.s32 40, %v1672_v17  ;;  %v1702_v47 = vadd.s32 80, %v1672_v17 }
 0x1f4   :  { %v631_v14 = vmul.f32 %v1098_v50, %v1597_v8  ;;  %v1100_v16 = vpop.eup %1099  ;;  %v1710_v50 = vadd.s32 96, %v1672_v17 }
 0x1f5   :  { %v632_v26 = vmul.f32 %v1100_v16, %v1584_v54  ;;  %v1102_v42 = vpop.eup %1101  ;;  %v1719_v16 = vadd.s32 120, %v1672_v17 }
 0x1f6   :  { %v633_v53 = vmul.f32 %v1102_v42, %v1594_v11  ;;  %v1104_v51 = vpop.eup %1103 }
 0x1f7   :  { %v634_v1 = vmul.f32 %v1104_v51, %v1604_v19  ;;  %v1106_v22 = vpop.eup %1105 }
 0x1f8   :  { %v635_v45 = vmul.f32 %v1106_v22, %v1592_v63  ;;  %v1108_v4 = vpop.eup %1107 }
 0x1f9   :  { %v636_v54 = vmul.f32 %v1108_v4, %v1602_v32 }
 0x1fb   :  { %645 = vxpose.xlu2.b32.cont [9/16] %v629_v29, 128  ;;  %v1699_v29 = vadd.s32 72, %v1672_v17 }
 0x203   :  { %646 = vxpose.xlu2.b32.cont [10/16] %v630_v40, 128  ;;  %v1705_v40 = vadd.s32 88, %v1672_v17 }
 0x20b   :  { %647 = vxpose.xlu2.b32.cont [11/16] %v631_v14, 128  ;;  %v1713_v14 = vadd.s32 104, %v1672_v17 }
 0x213   :  { %648 = vxpose.xlu2.b32.cont [12/16] %v632_v26, 128 }
 0x21b   :  { %649 = vxpose.xlu2.b32.cont [13/16] %v633_v53, 128 }
 0x223   :  { %650 = vxpose.xlu2.b32.cont [14/16] %v634_v1, 128 }
 0x22b   :  { %651 = vxpose.xlu2.b32.cont [15/16] %v635_v45, 128 }
 0x233   :  { %652 = vxpose.xlu2.b32.end [16/16] %v636_v54, 128 }
 0x254   :  { %v1623_v5 = vpop.trf.xlu2 }
 0x25c   :  { %v1625_v6 = vpop.trf.xlu2 }
 0x264   :  { %v1627_v37 = vpop.trf.xlu2 }
 0x26c   :  { %v1629_v44 = vpop.trf.xlu2 }
 0x274   :  { %v1631_v58 = vpop.trf.xlu2 }
 0x275   :  { %v686_v55 = vmax.f32 %v1623_v5, %v1631_v58 }
 0x27c   :  { %v1633_v7 = vpop.trf.xlu2 }
 0x27d   :  { %v687_v23 = vmax.f32 %v1625_v6, %v1633_v7 }
 0x284   :  { %v1635_v11 = vpop.trf.xlu2 }
 0x285   :  { %v688_v31 = vmax.f32 %v1627_v37, %v1635_v11 }
 0x28c   :  { %v1637_v63 = vpop.trf.xlu2 }
 0x28d   :  { %v689_v28 = vmax.f32 %v1629_v44, %v1637_v63 }
 0x294   :  { %v1639_v13 = vpop.trf.xlu2 }
 0x295   :  { %v690_v12 = vmax.f32 %v686_v55, %v1639_v13 }
 0x29c   :  { %v1641_v8 = vpop.trf.xlu2 }
 0x29d   :  { %v691_v36 = vmax.f32 %v687_v23, %v1641_v8 }
 0x2a4   :  { %v1643_v57 = vpop.trf.xlu2 }
 0x2a5   :  { %v692_v52 = vmax.f32 %v688_v31, %v1643_v57 }
 0x2ac   :  { %v1645_v32 = vpop.trf.xlu2 }
 0x2ad   :  { %v693_v27 = vmax.f32 %v689_v28, %v1645_v32 }
 0x2b4   :  { %v1647_v3 = vpop.trf.xlu2 }
 0x2b5   :  { %v694_v41 = vmax.f32 %v690_v12, %v1647_v3 }
 0x2bc   :  { %v1649_v19 = vpop.trf.xlu2 }
 0x2bd   :  { %v695_v10 = vmax.f32 %v691_v36, %v1649_v19 }
 0x2bf   :  { %v698_v61 = vmax.f32 %v694_v41, %v695_v10 }
 0x2c4   :  { %v1651_v21 = vpop.trf.xlu2 }
 0x2c5   :  { %v696_v9 = vmax.f32 %v692_v52, %v1651_v21 }
 0x2cc   :  { %v1666_v33 = vpop.trf.xlu2 }
 0x2cd   :  { %v697_v15 = vmax.f32 %v693_v27, %v1666_v33 }
 0x2cf   :  { %v699_v30 = vmax.f32 %v696_v9, %v697_v15 }
 0x2d1   :  { %v700_v18 = vmax.f32 %v698_v61, %v699_v30 }
 0x2d3   :  { %v701_v24 = vrot.slane %v700_v18, 4 }
 0x2d5   :  { %v702_v35 = vmax.f32 %v700_v18, %v701_v24 }
 0x2d7   :  { %v703_v34 = vrot.slane %v702_v35, 2 }
 0x2d9   :  { %v704_v56 = vmax.f32 %v702_v35, %v703_v34 }
 0x2db   :  { %v705_v46 = vrot.slane %v704_v56, 1 }
 0x2dd   :  { %v1707_v60 = vmax.f32 %v704_v56, %v705_v46 }
 0x2df   :  { %vm707_vm2 = vcmp.eq.f32.partialorder %v1623_v5, %v1707_v60  ;;  %vm708_vm3 = vcmp.eq.f32.partialorder %v1625_v6, %v1707_v60  ;;  %vm709_vm4 = vcmp.eq.f32.partialorder %v1627_v37, %v1707_v60  ;;  %vm710_vm5 = vcmp.eq.f32.partialorder %v1629_v44, %v1707_v60 }
 0x2e0   :  { %vm711_vm6 = vcmp.eq.f32.partialorder %v1631_v58, %v1707_v60  ;;  %vm712_vm7 = vcmp.eq.f32.partialorder %v1633_v7, %v1707_v60  ;;  %vm713_vm8 = vcmp.eq.f32.partialorder %v1635_v11, %v1707_v60  ;;  %vm714_vm9 = vcmp.eq.f32.partialorder %v1637_v63, %v1707_v60 }
 0x2e1   :  { %vm715_vm10 = vcmp.eq.f32.partialorder %v1639_v13, %v1707_v60  ;;  %vm716_vm11 = vcmp.eq.f32.partialorder %v1641_v8, %v1707_v60  ;;  %vm717_vm12 = vcmp.eq.f32.partialorder %v1643_v57, %v1707_v60  ;;  %vm718_vm13 = vcmp.eq.f32.partialorder %v1645_v32, %v1707_v60 }
 0x2e2   :  { %vm719_vm14 = vcmp.eq.f32.partialorder %v1647_v3, %v1707_v60  ;;  %vm720_vm15 = vcmp.eq.f32.partialorder %v1649_v19, %v1707_v60  ;;  %vm721_vm0 = vcmp.eq.f32.partialorder %v1651_v21, %v1707_v60  ;;  %vm722_vm1 = vcmp.eq.f32.partialorder %v1666_v33, %v1707_v60 }
 0x2e3   :  { %v723_v26 = vsel %vm707_vm2, %v1672_v17, 128  ;;  %v724_v42 = vsel %vm708_vm3, %v1675_v38, 128  ;;  %v725_v53 = vsel %vm709_vm4, %v1678_v20, 128  ;;  %v726_v62 = vsel %vm710_vm5, %v1681_v2, 128 }
 0x2e4   :  { %v727_v51 = vsel %vm711_vm6, %v1684_v39, 128  ;;  %v728_v1 = vsel %vm712_vm7, %v1687_v0, 128  ;;  %v729_v49 = vsel %vm713_vm8, %v1690_v43, 128  ;;  %v730_v22 = vsel %vm714_vm9, %v1693_v48, 128 }
 0x2e5   :  { %v731_v45 = vsel %vm715_vm10, %v1696_v25, 128  ;;  %v732_v4 = vsel %vm716_vm11, %v1699_v29, 128  ;;  %v733_v54 = vsel %vm717_vm12, %v1702_v47, 128  ;;  %v734_v23 = vsel %vm718_vm13, %v1705_v40, 128 }
 0x2e6   :  { %v735_v55 = vsel %vm719_vm14, %v1710_v50, 128  ;;  %v736_v31 = vsel %vm720_vm15, %v1713_v14, 128  ;;  %v737_v28 = vsel %vm721_vm0, %v1716_v59, 128  ;;  %v738_v36 = vsel %vm722_vm1, %v1719_v16, 128 }
 0x2e7   :  { %vm739_vm2 = vcmp.lt.s32.totalorder %v723_v26, %v727_v51  ;;  %vm741_vm3 = vcmp.lt.s32.totalorder %v724_v42, %v728_v1  ;;  %vm743_vm4 = vcmp.lt.s32.totalorder %v725_v53, %v729_v49  ;;  %vm745_vm5 = vcmp.lt.s32.totalorder %v726_v62, %v730_v22 }
 0x2e8   :  { %v740_v12 = vsel %vm739_vm2, %v723_v26, %v727_v51  ;;  %v742_v52 = vsel %vm741_vm3, %v724_v42, %v728_v1  ;;  %v744_v27 = vsel %vm743_vm4, %v725_v53, %v729_v49  ;;  %v746_v10 = vsel %vm745_vm5, %v726_v62, %v730_v22 }
 0x2e9   :  { %vm747_vm6 = vcmp.lt.s32.totalorder %v740_v12, %v731_v45  ;;  %vm749_vm7 = vcmp.lt.s32.totalorder %v742_v52, %v732_v4  ;;  %vm751_vm8 = vcmp.lt.s32.totalorder %v744_v27, %v733_v54  ;;  %vm753_vm9 = vcmp.lt.s32.totalorder %v746_v10, %v734_v23 }
 0x2ea   :  { %v748_v41 = vsel %vm747_vm6, %v740_v12, %v731_v45  ;;  %v750_v9 = vsel %vm749_vm7, %v742_v52, %v732_v4  ;;  %v752_v15 = vsel %vm751_vm8, %v744_v27, %v733_v54  ;;  %v754_v61 = vsel %vm753_vm9, %v746_v10, %v734_v23 }
 0x2eb   :  { %vm755_vm10 = vcmp.lt.s32.totalorder %v748_v41, %v735_v55  ;;  %vm757_vm11 = vcmp.lt.s32.totalorder %v750_v9, %v736_v31  ;;  %vm759_vm12 = vcmp.lt.s32.totalorder %v752_v15, %v737_v28  ;;  %vm761_vm13 = vcmp.lt.s32.totalorder %v754_v61, %v738_v36 }
 0x2ec   :  { %v756_v30 = vsel %vm755_vm10, %v748_v41, %v735_v55  ;;  %v758_v18 = vsel %vm757_vm11, %v750_v9, %v736_v31  ;;  %v760_v24 = vsel %vm759_vm12, %v752_v15, %v737_v28  ;;  %v762_v35 = vsel %vm761_vm13, %v754_v61, %v738_v36 }
 0x2ed   :  { %vm763_vm14 = vcmp.lt.s32.totalorder %v756_v30, %v758_v18  ;;  %vm765_vm15 = vcmp.lt.s32.totalorder %v760_v24, %v762_v35 }
 0x2ee   :  { %v764_v34 = vsel %vm763_vm14, %v756_v30, %v758_v18  ;;  %v766_v56 = vsel %vm765_vm15, %v760_v24, %v762_v35 }
 0x2ef   :  { %vm767_vm0 = vcmp.lt.s32.totalorder %v764_v34, %v766_v56 }
 0x2f0   :  { %v768_v46 = vsel %vm767_vm0, %v764_v34, %v766_v56 }
 0x2f1   :  { %v769_v26 = vrot.slane %v768_v46, 4 }
 0x2f3   :  { %vm770_vm1 = vcmp.lt.s32.totalorder %v768_v46, %v769_v26 }
 0x2f4   :  { %v771_v42 = vsel %vm770_vm1, %v768_v46, %v769_v26 }
 0x2f5   :  { %v772_v53 = vrot.slane %v771_v42, 2 }
 0x2f7   :  { %vm773_vm2 = vcmp.lt.s32.totalorder %v771_v42, %v772_v53 }
 0x2f8   :  { %v774_v62 = vsel %vm773_vm2, %v771_v42, %v772_v53 }
 0x2f9   :  { %v775_v51 = vrot.slane %v774_v62, 1 }
 0x2fb   :  { %vm776_vm3 = vcmp.lt.s32.totalorder %v774_v62, %v775_v51 }
 0x2fc   :  { %v1817_v1 = vsel %vm776_vm3, %v774_v62, %v775_v51 }
 0x2fd   :  { %vm778_vm4 = vcmp.eq.s32.totalorder %v1672_v17, %v1817_v1  ;;  %vm779_vm5 = vcmp.eq.s32.totalorder %v1675_v38, %v1817_v1  ;;  %vm780_vm6 = vcmp.eq.s32.totalorder %v1678_v20, %v1817_v1  ;;  %vm781_vm7 = vcmp.eq.s32.totalorder %v1681_v2, %v1817_v1 }
 0x2fe   :  { %vm782_vm8 = vcmp.eq.s32.totalorder %v1684_v39, %v1817_v1  ;;  %vm783_vm9 = vcmp.eq.s32.totalorder %v1687_v0, %v1817_v1  ;;  %vm784_vm10 = vcmp.eq.s32.totalorder %v1690_v43, %v1817_v1  ;;  %vm785_vm11 = vcmp.eq.s32.totalorder %v1693_v48, %v1817_v1 }
 0x2ff   :  { %vm790_vm12 = vcmp.eq.s32.totalorder %v1710_v50, %v1817_v1  ;;  %v794_v49 = vsel %vm778_vm4, -inf, %v1623_v5  ;;  %v795_v22 = vsel %vm779_vm5, -inf, %v1625_v6  ;;  %v796_v45 = vsel %vm780_vm6, -inf, %v1627_v37 }
 0x300   :  { %v797_v4 = vsel %vm781_vm7, -inf, %v1629_v44  ;;  %v798_v54 = vsel %vm782_vm8, -inf, %v1631_v58  ;;  %v799_v23 = vsel %vm783_vm9, -inf, %v1633_v7  ;;  %v800_v55 = vsel %vm784_vm10, -inf, %v1635_v11 }
 0x301   :  { %v801_v31 = vsel %vm785_vm11, -inf, %v1637_v63  ;;  %vm786_vm13 = vcmp.eq.s32.totalorder %v1696_v25, %v1817_v1  ;;  %vm787_vm14 = vcmp.eq.s32.totalorder %v1699_v29, %v1817_v1  ;;  %vm788_vm15 = vcmp.eq.s32.totalorder %v1702_v47, %v1817_v1 }
 0x302   :  { %vm789_vm0 = vcmp.eq.s32.totalorder %v1705_v40, %v1817_v1  ;;  %vm791_vm1 = vcmp.eq.s32.totalorder %v1713_v14, %v1817_v1  ;;  %vm792_vm2 = vcmp.eq.s32.totalorder %v1716_v59, %v1817_v1  ;;  %vm793_vm3 = vcmp.eq.s32.totalorder %v1719_v16, %v1817_v1 }
 0x303   :  { %v806_v5 = vsel %vm790_vm12, -inf, %v1647_v3  ;;  %v810_v6 = vmax.f32 %v794_v49, %v798_v54  ;;  %v811_v37 = vmax.f32 %v795_v22, %v799_v23  ;;  %v812_v44 = vmax.f32 %v796_v45, %v800_v55 }
 0x304   :  { %v813_v58 = vmax.f32 %v797_v4, %v801_v31  ;;  %v802_v7 = vsel %vm786_vm13, -inf, %v1639_v13  ;;  %v803_v11 = vsel %vm787_vm14, -inf, %v1641_v8  ;;  %v804_v63 = vsel %vm788_vm15, -inf, %v1643_v57 }
 0x305   :  { %v805_v28 = vsel %vm789_vm0, -inf, %v1645_v32  ;;  %v814_v36 = vmax.f32 %v810_v6, %v802_v7  ;;  %v815_v12 = vmax.f32 %v811_v37, %v803_v11  ;;  %v816_v52 = vmax.f32 %v812_v44, %v804_v63 }
 0x306   :  { %v817_v27 = vmax.f32 %v813_v58, %v805_v28  ;;  %v807_v3 = vsel %vm791_vm1, -inf, %v1649_v19  ;;  %v808_v13 = vsel %vm792_vm2, -inf, %v1651_v21  ;;  %v809_v8 = vsel %vm793_vm3, -inf, %v1666_v33 }
 0x307   :  { %v818_v57 = vmax.f32 %v814_v36, %v806_v5  ;;  %v819_v32 = vmax.f32 %v815_v12, %v807_v3  ;;  %v820_v10 = vmax.f32 %v816_v52, %v808_v13 }
 0x308   :  { %v821_v41 = vmax.f32 %v817_v27, %v809_v8 }
 0x309   :  { %v822_v9 = vmax.f32 %v818_v57, %v819_v32 }
 0x30a   :  { %v823_v15 = vmax.f32 %v820_v10, %v821_v41 }
 0x30c   :  { %v824_v61 = vmax.f32 %v822_v9, %v823_v15 }
 0x30e   :  { %v825_v30 = vrot.slane %v824_v61, 4 }
 0x310   :  { %v826_v18 = vmax.f32 %v824_v61, %v825_v30 }
 0x312   :  { %v827_v19 = vrot.slane %v826_v18, 2 }
 0x314   :  { %v828_v24 = vmax.f32 %v826_v18, %v827_v19 }
 0x316   :  { %v829_v35 = vrot.slane %v828_v24, 1 }
 0x318   :  { %v1879_v34 = vmax.f32 %v828_v24, %v829_v35 }
 0x31a   :  { %vm831_vm4 = vcmp.eq.f32.partialorder %v794_v49, %v1879_v34  ;;  %vm832_vm5 = vcmp.eq.f32.partialorder %v795_v22, %v1879_v34  ;;  %vm833_vm6 = vcmp.eq.f32.partialorder %v796_v45, %v1879_v34  ;;  %vm834_vm7 = vcmp.eq.f32.partialorder %v797_v4, %v1879_v34 }
 0x31b   :  { %vm835_vm8 = vcmp.eq.f32.partialorder %v798_v54, %v1879_v34  ;;  %vm837_vm10 = vcmp.eq.f32.partialorder %v800_v55, %v1879_v34  ;;  %vm838_vm11 = vcmp.eq.f32.partialorder %v801_v31, %v1879_v34  ;;  %vm839_vm12 = vcmp.eq.f32.partialorder %v802_v7, %v1879_v34 }
 0x31c   :  { %vm840_vm13 = vcmp.eq.f32.partialorder %v803_v11, %v1879_v34  ;;  %vm841_vm14 = vcmp.eq.f32.partialorder %v804_v63, %v1879_v34  ;;  %vm842_vm15 = vcmp.eq.f32.partialorder %v805_v28, %v1879_v34  ;;  %vm843_vm0 = vcmp.eq.f32.partialorder %v806_v5, %v1879_v34 }
 0x31d   :  { %vm844_vm1 = vcmp.eq.f32.partialorder %v807_v3, %v1879_v34  ;;  %vm845_vm2 = vcmp.eq.f32.partialorder %v808_v13, %v1879_v34  ;;  %vm846_vm3 = vcmp.eq.f32.partialorder %v809_v8, %v1879_v34  ;;  %v847_v21 = vsel %vm831_vm4, %v1672_v17, 128 }
 0x31e   :  { %v848_v33 = vsel %vm832_vm5, %v1675_v38, 128  ;;  %v849_v56 = vsel %vm833_vm6, %v1678_v20, 128  ;;  %v850_v46 = vsel %vm834_vm7, %v1681_v2, 128  ;;  %v851_v26 = vsel %vm835_vm8, %v1684_v39, 128 }
 0x31f   :  { %vm1974_vm9 = vcmp.eq.f32.partialorder %v799_v23, %v1879_v34  ;;  %v853_v38 = vsel %vm837_vm10, %v1690_v43, 128  ;;  %v854_v20 = vsel %vm838_vm11, %v1693_v48, 128  ;;  %v855_v2 = vsel %vm839_vm12, %v1696_v25, 128 }
 0x320   :  { %v852_v17 = vsel %vm1974_vm9, %v1687_v0, 128  ;;  %v856_v39 = vsel %vm840_vm13, %v1699_v29, 128  ;;  %v857_v0 = vsel %vm841_vm14, %v1702_v47, 128  ;;  %v858_v43 = vsel %vm842_vm15, %v1705_v40, 128 }
 0x321   :  { %v859_v48 = vsel %vm843_vm0, %v1710_v50, 128  ;;  %v860_v25 = vsel %vm844_vm1, %v1713_v14, 128  ;;  %v861_v29 = vsel %vm845_vm2, %v1716_v59, 128  ;;  %v862_v47 = vsel %vm846_vm3, %v1719_v16, 128 }
 0x322   :  { %vm863_vm4 = vcmp.lt.s32.totalorder %v847_v21, %v851_v26  ;;  %vm865_vm5 = vcmp.lt.s32.totalorder %v848_v33, %v852_v17  ;;  %vm867_vm6 = vcmp.lt.s32.totalorder %v849_v56, %v853_v38  ;;  %vm869_vm7 = vcmp.lt.s32.totalorder %v850_v46, %v854_v20 }
 0x323   :  { %v864_v40 = vsel %vm863_vm4, %v847_v21, %v851_v26  ;;  %v866_v42 = vsel %vm865_vm5, %v848_v33, %v852_v17  ;;  %v868_v53 = vsel %vm867_vm6, %v849_v56, %v853_v38  ;;  %v870_v50 = vsel %vm869_vm7, %v850_v46, %v854_v20 }
 0x324   :  { %vm871_vm8 = vcmp.lt.s32.totalorder %v864_v40, %v855_v2  ;;  %vm873_vm9 = vcmp.lt.s32.totalorder %v866_v42, %v856_v39  ;;  %vm875_vm10 = vcmp.lt.s32.totalorder %v868_v53, %v857_v0  ;;  %vm877_vm11 = vcmp.lt.s32.totalorder %v870_v50, %v858_v43 }
 0x325   :  { %v872_v14 = vsel %vm871_vm8, %v864_v40, %v855_v2  ;;  %v874_v59 = vsel %vm873_vm9, %v866_v42, %v856_v39  ;;  %v876_v16 = vsel %vm875_vm10, %v868_v53, %v857_v0  ;;  %v878_v62 = vsel %vm877_vm11, %v870_v50, %v858_v43 }
 0x326   :  { %vm879_vm12 = vcmp.lt.s32.totalorder %v872_v14, %v859_v48  ;;  %vm881_vm13 = vcmp.lt.s32.totalorder %v874_v59, %v860_v25  ;;  %vm883_vm14 = vcmp.lt.s32.totalorder %v876_v16, %v861_v29  ;;  %vm885_vm15 = vcmp.lt.s32.totalorder %v878_v62, %v862_v47 }
 0x327   :  { %v880_v51 = vsel %vm879_vm12, %v872_v14, %v859_v48  ;;  %v882_v49 = vsel %vm881_vm13, %v874_v59, %v860_v25  ;;  %v884_v22 = vsel %vm883_vm14, %v876_v16, %v861_v29  ;;  %v886_v45 = vsel %vm885_vm15, %v878_v62, %v862_v47 }
 0x328   :  { %vm887_vm0 = vcmp.lt.s32.totalorder %v880_v51, %v882_v49  ;;  %vm889_vm1 = vcmp.lt.s32.totalorder %v884_v22, %v886_v45  ;;  %vm1975_vm2 = vcmask 1040384  }
 0x329   :  { %v903_v4 = vsel %vm1975_vm2, %v1707_v60, %v1879_v34  ;;  %v888_v54 = vsel %vm887_vm0, %v880_v51, %v882_v49  ;;  %v890_v23 = vsel %vm889_vm1, %v884_v22, %v886_v45  ;;  %vm1976_vm7 = vmmov %vm1975_vm2 }
 0x32a   :  { %904 = vst [vmem:[#allocation2] sm:$0x3] %v903_v4  ;;  %vm891_vm3 = vcmp.lt.s32.totalorder %v888_v54, %v890_v23 }
 0x32b   :  { %917 = dma.vmem_to_hbm [thread:$0]  %s913_s5, 32, %s915_s8, [#allocation3]   ;;  %v892_v55 = vsel %vm891_vm3, %v888_v54, %v890_v23 }
 0x32c   :  { %v893_v31 = vrot.slane %v892_v55, 4 }
 0x32e   :  { %vm894_vm4 = vcmp.lt.s32.totalorder %v892_v55, %v893_v31 }
 0x32f   :  { %v895_v5 = vsel %vm894_vm4, %v892_v55, %v893_v31 }
 0x330   :  { %v896_v6 = vrot.slane %v895_v5, 2 }
 0x332   :  { %vm897_vm5 = vcmp.lt.s32.totalorder %v895_v5, %v896_v6 }
 0x333   :  { %v898_v37 = vsel %vm897_vm5, %v895_v5, %v896_v6 }
 0x334   :  { %v899_v44 = vrot.slane %v898_v37, 1 }
 0x336   :  { %vm900_vm6 = vcmp.lt.s32.totalorder %v898_v37, %v899_v44 }
 0x337   :  { %v901_v60 = vsel %vm900_vm6, %v898_v37, %v899_v44 }
 0x338   :  { %v905_v58 = vsel %vm1976_vm7, %v1817_v1, %v901_v60 }
 0x339   :  { %906 = vst [vmem:[#allocation4] sm:$0x3] %v905_v58 }
 0x33a   :  { %928 = dma.vmem_to_hbm [thread:$0]  %s924_s1, 32, %s926_s11, [#allocation5]  }
 0x33b   :  { %1157 = dma.done.wait [#allocation3], 32  }
 0x33c   :  { %1158 = vsyncadd [#allocation3], 4294967264 }
 0x33d   :  { %1159 = dma.done.wait [#allocation5], 32  }
 0x33e   :  { %1160 = vsyncadd [#allocation5], 4294967264 }
 0x33f   :  { %937 = vsyncpa [#allocation3], 1 }
 0x340   :  { %938 = vsyncpa [#allocation5], 1 }

</bundles_post_ra>
